<compile_context>
chip_gen: v5e
topology: v5e:2x2
jax: 0.10.0
libtpu: 0.0.40
codegen_flags: <defaults>
</compile_context>

<pallas_src>
import functools

import jax
import jax.numpy as jnp
from jax.experimental import pallas as pl
from jax.experimental.pallas import tpu as pltpu


def _round_up(x, m):
    return ((x + m - 1) // m) * m


def _rnn_chunk_kernel(emb_ref, wih_ref, bias_ref, whh_ref, hs_ref, xp_ref, h_ref):
    """One (batch-block, time-chunk) tile of the tanh-RNN.

    emb_ref  : (TS, B_BLK, H_in) f32   embedded inputs for this chunk
    wih_ref  : (H_in, Hp)  compute dt  W_ih^T, zero-padded
    bias_ref : (1, Hp)     f32         b_ih + b_hh, zero-padded
    whh_ref  : (Hp, Hp)    compute dt  W_hh^T, zero-padded
    hs_ref   : (TS, B_BLK, Hp)         hidden states h_t for this chunk (output)
    xp_ref   : (TS*B_BLK, Hp) f32      scratch: time-parallel input projection
    h_ref    : (B_BLK, Hp)    f32      scratch: hidden state carried across chunks
    """
    ts, b_blk, h_in = emb_ref.shape
    hp = whh_ref.shape[1]

    # h_0 = 0 at the start of every batch block's time scan.
    @pl.when(pl.program_id(1) == 0)
    def _():
        h_ref[...] = jnp.zeros_like(h_ref)

    # Time-parallel input projection for the whole chunk: one dense MXU matmul
    # off the serial critical path (x_t @ W_ih^T + b_ih + b_hh).
    emb2d = emb_ref[...].reshape(ts * b_blk, h_in).astype(wih_ref.dtype)
    xp_ref[...] = (
        jnp.dot(emb2d, wih_ref[...], preferred_element_type=jnp.float32)
        + bias_ref[...]
    )

    # Hoist W_hh^T into vregs only while it fits comfortably (Hp == 128 is 16
    # f32 / 8 bf16 vregs); for larger Hp read it from VMEM every step (vld
    # slots have slack) instead of guaranteeing spills around the loop body.
    if hp <= 128:
        w_hh_t = whh_ref[...]

        def rec_dot(h):
            return jnp.dot(h.astype(w_hh_t.dtype), w_hh_t,
                           preferred_element_type=jnp.float32)
    else:
        def rec_dot(h):
            return jnp.dot(h.astype(whh_ref.dtype), whh_ref[...],
                           preferred_element_type=jnp.float32)

    def step(t, h):
        row0 = pl.multiple_of(t * b_blk, b_blk)
        pre = xp_ref[pl.ds(row0, b_blk), :] + rec_dot(h)
        h_new = jnp.tanh(pre)                      # f32 carry / EUP tanh
        hs_ref[t] = h_new.astype(hs_ref.dtype)
        return h_new

    # Modest unroll: overlaps the hs store, next xp load and tanh of step t
    # with the MXU work of step t+1 (only h is loop-carried).
    unroll = ts if ts <= 8 else 4
    h_ref[...] = jax.lax.fori_loop(0, ts, step, h_ref[...], unroll=unroll)


def mamba_forward(token_ids, params, *, compute_dtype=jnp.float32):
    """token_ids: (seq_len, batch) int32 -> (seq_len, batch, output_size).

    compute_dtype controls only the MXU operand dtype and the hidden-state
    writeback dtype; the recurrence carry, bias add and tanh stay f32.
    """
    emb, w_ih, b_ih, w_hh, b_hh, w_fc, b_fc = (
        params["emb"], params["w_ih"], params["b_ih"],
        params["w_hh"], params["b_hh"], params["w_fc"], params["b_fc"])

    S, B = token_ids.shape
    H = emb.shape[1]
    O = w_fc.shape[0]

    Hp = _round_up(H, 128)                       # lane-pad hidden dim

    # ---- batch block: as many MXU LHS rows as possible, but keep >= 2 blocks
    # so the "parallel" grid axis actually feeds both TensorCores on v7x.
    B8 = _round_up(B, 8)
    if B8 <= 8:
        b_blk = B8
    elif B8 <= 512:
        b_blk = _round_up((B8 + 1) // 2, 8)      # exactly two batch blocks
    else:
        b_blk = 256
    Bp = _round_up(B8, b_blk)
    n_bblk = Bp // b_blk

    # ---- time chunk: bound VMEM independent of S (sized for v7x's 64 MiB). --
    out_bytes = jnp.finfo(compute_dtype).bits // 8
    bytes_per_t = b_blk * (2 * H * 4             # double-buffered embedded chunk
                           + 2 * Hp * out_bytes  # double-buffered hs chunk
                           + Hp * 4)             # x_proj scratch
    budget = 20 * 1024 * 1024
    ts = max(1, min(S, budget // bytes_per_t, 512))
    if ts > 8:
        ts = (ts // 8) * 8
    Sp = _round_up(S, ts)
    n_tchunk = Sp // ts

    # ---- glue: embedding lookup (gather) stays in XLA ------------------------
    embedded = jnp.take(emb, token_ids, axis=0).astype(jnp.float32)   # (S,B,H)
    # Pad directly (no extra at[].set copy). Only this small (Sp,Bp,H) stream
    # hits HBM; the input projection runs inside the kernel.
    embedded_p = jnp.pad(embedded, ((0, Sp - S), (0, Bp - B), (0, 0)))

    w_ih_t_p = jnp.zeros((H, Hp), compute_dtype).at[:, :H].set(
        w_ih.T.astype(compute_dtype))
    bias_p = jnp.zeros((1, Hp), jnp.float32).at[0, :H].set(
        (b_ih + b_hh).astype(jnp.float32))
    w_hh_t_p = jnp.zeros((Hp, Hp), compute_dtype).at[:H, :H].set(
        w_hh.T.astype(compute_dtype))

    grid_spec = pltpu.PrefetchScalarGridSpec(
        num_scalar_prefetch=0,
        grid=(n_bblk, n_tchunk),                  # batch parallel, time serial (last)
        in_specs=[
            pl.BlockSpec((ts, b_blk, H), lambda b, t: (t, b, 0)),   # embedded
            # Constant index maps: Pallas skips re-DMA of the weights across
            # grid steps, so they stay VMEM-resident for the whole scan.
            pl.BlockSpec((H, Hp), lambda b, t: (0, 0)),             # W_ih^T
            pl.BlockSpec((1, Hp), lambda b, t: (0, 0)),             # bias
            pl.BlockSpec((Hp, Hp), lambda b, t: (0, 0)),            # W_hh^T
        ],
        out_specs=pl.BlockSpec((ts, b_blk, Hp), lambda b, t: (t, b, 0)),
        scratch_shapes=[
            pltpu.VMEM((ts * b_blk, Hp), jnp.float32),   # x_proj chunk
            pltpu.VMEM((b_blk, Hp), jnp.float32),        # hidden-state carry
        ],
    )

    hs_p = pl.pallas_call(
        _rnn_chunk_kernel,
        out_shape=jax.ShapeDtypeStruct((Sp, Bp, Hp), compute_dtype),
        grid_spec=grid_spec,
        compiler_params=pltpu.CompilerParams(
            dimension_semantics=("parallel", "arbitrary"),
            vmem_limit_bytes=48 * 1024 * 1024),
    )(embedded_p, w_ih_t_p, bias_p, w_hh_t_p)

    hs = hs_p[:S, :B, :H].astype(jnp.float32)             # drop padding

    # ---- hoisted, time-parallel output projection (fc) -----------------------
    out = (hs.reshape(S * B, H) @ w_fc.T + b_fc).reshape(S, B, O)
    return out


def mamba_reference(token_ids, params):
    """Pure-JAX reference (matches PyTorch nn.RNN(tanh) + Linear semantics)."""
    emb, w_ih, b_ih, w_hh, b_hh, w_fc, b_fc = (
        params["emb"], params["w_ih"], params["b_ih"],
        params["w_hh"], params["b_hh"], params["w_fc"], params["b_fc"])
    embedded = jnp.take(emb, token_ids, axis=0)            # (S, B, H)
    B = token_ids.shape[1]
    H = emb.shape[1]
    h0 = jnp.zeros((B, H), jnp.float32)

    def step(h, x_t):
        h_new = jnp.tanh(x_t @ w_ih.T + b_ih + h @ w_hh.T + b_hh)
        return h_new, h_new

    _, hs = jax.lax.scan(step, h0, embedded)               # (S, B, H)
    return hs @ w_fc.T + b_fc                              # (S, B, O)


if __name__ == "__main__":
    # Small, deterministic setup.
    input_size = 16    # vocab
    hidden_size = 32
    output_size = 8
    seq_len = 8
    batch = 4

    key = jax.random.PRNGKey(0)
    k_emb, k_wih, k_bih, k_whh, k_bhh, k_wfc, k_bfc, k_ids = jax.random.split(key, 8)

    params = {
        "emb":  jax.random.normal(k_emb, (input_size, hidden_size), jnp.float32) * 0.1,
        "w_ih": jax.random.normal(k_wih, (hidden_size, hidden_size), jnp.float32) * 0.1,
        "b_ih": jax.random.normal(k_bih, (hidden_size,), jnp.float32) * 0.1,
        "w_hh": jax.random.normal(k_whh, (hidden_size, hidden_size), jnp.float32) * 0.1,
        "b_hh": jax.random.normal(k_bhh, (hidden_size,), jnp.float32) * 0.1,
        "w_fc": jax.random.normal(k_wfc, (output_size, hidden_size), jnp.float32) * 0.1,
        "b_fc": jax.random.normal(k_bfc, (output_size,), jnp.float32) * 0.1,
    }

    token_ids = jax.random.randint(k_ids, (seq_len, batch), 0, input_size, jnp.int32)

    # f32 path: strict check vs the pure-JAX reference.
    out = jax.block_until_ready(jax.jit(mamba_forward)(token_ids, params))
    ref = jax.block_until_ready(mamba_reference(token_ids, params))
    assert out.shape == (seq_len, batch, output_size)
    assert jnp.allclose(out, ref, atol=1e-5, rtol=1e-5), "f32 path mismatch vs reference"

    # bf16 MXU-operand path (fast path on v6e/v7x): f32 carry/tanh, bf16 dot
    # operands + hidden-state writeback -> looser tolerance.
    fwd_bf16 = jax.jit(functools.partial(mamba_forward, compute_dtype=jnp.bfloat16))
    out_bf16 = jax.block_until_ready(fwd_bf16(token_ids, params))
    assert jnp.allclose(out_bf16, ref, atol=2e-2, rtol=2e-2), "bf16 path mismatch vs reference"

    print("KERNEL_OK")
</pallas_src>

<mosaic_0001>
module attributes {stable_mosaic.version = 11 : i64} {
  func.func @_rnn_chunk_kernel(%arg0: i32, %arg1: i32, %arg2: memref<8x8x32xf32, #tpu.memory_space<vmem>>, %arg3: memref<32x128xf32, #tpu.memory_space<vmem>>, %arg4: memref<1x128xf32, #tpu.memory_space<vmem>>, %arg5: memref<128x128xf32, #tpu.memory_space<vmem>>, %arg6: memref<8x8x128xf32, #tpu.memory_space<vmem>>, %arg7: memref<64x128xf32, #tpu.memory_space<vmem>>, %arg8: memref<8x128xf32, #tpu.memory_space<vmem>>) attributes {dimension_semantics = [#tpu.dimension_semantics<parallel>, #tpu.dimension_semantics<arbitrary>], iteration_bounds = array<i64: 1, 1>, scalar_prefetch = 0 : i64, scratch_operands = 2 : i64, tpu.core_type = #tpu.core_type<tc>, window_params = [{transform_indices = @transform_0, window_bounds = array<i64: 8, 8, 32>}, {pipeline_mode = #tpu.pipeline_mode<synchronous>, transform_indices = @transform_1, window_bounds = array<i64: 32, 128>}, {pipeline_mode = #tpu.pipeline_mode<synchronous>, transform_indices = @transform_2, window_bounds = array<i64: 1, 128>}, {pipeline_mode = #tpu.pipeline_mode<synchronous>, transform_indices = @transform_3, window_bounds = array<i64: 128, 128>}, {transform_indices = @transform_4, window_bounds = array<i64: 8, 8, 128>}]} {
    %c0_i32 = arith.constant 0 : i32
    %0 = arith.cmpi eq, %arg1, %c0_i32 : i32
    %1 = arith.extui %0 : i1 to i32
    %c0_i32_0 = arith.constant 0 : i32
    %2 = arith.cmpi ne, %1, %c0_i32_0 : i32
    scf.if %2 {
      %cst_56 = arith.constant 0.000000e+00 : f32
      %102 = vector.broadcast %cst_56 : f32 to vector<8x128xf32>
      %c0_57 = arith.constant 0 : index
      %c0_58 = arith.constant 0 : index
      %103 = vector.load %arg8[%c0_57, %c0_58] : memref<8x128xf32, #tpu.memory_space<vmem>>, vector<8x128xf32>
      tpu.vector_store %arg8[%c0_57, %c0_58], %102 {strides = array<i32>} : memref<8x128xf32, #tpu.memory_space<vmem>>, vector<8x128xf32>,
    } else {
    }
    %c0 = arith.constant 0 : index
    %c0_1 = arith.constant 0 : index
    %c0_2 = arith.constant 0 : index
    %3 = vector.load %arg2[%c0, %c0_1, %c0_2] : memref<8x8x32xf32, #tpu.memory_space<vmem>>, vector<8x8x32xf32>
    %4 = vector.shape_cast %3 : vector<8x8x32xf32> to vector<64x32xf32>
    %c0_3 = arith.constant 0 : index
    %c0_4 = arith.constant 0 : index
    %5 = vector.load %arg3[%c0_3, %c0_4] : memref<32x128xf32, #tpu.memory_space<vmem>>, vector<32x128xf32>
    %cst = arith.constant dense<0.000000e+00> : vector<64x128xf32>
    %6 = tpu.matmul %4, %5, %cst {dimension_numbers = #tpu.dot_dimension_numbers<[1], [0], [0], [1], [0, 0, 1, 1], [], []>} : vector<64x32xf32>, vector<32x128xf32>, vector<64x128xf32> -> vector<64x128xf32>
    %c0_5 = arith.constant 0 : index
    %c0_6 = arith.constant 0 : index
    %7 = vector.load %arg4[%c0_5, %c0_6] : memref<1x128xf32, #tpu.memory_space<vmem>>, vector<1x128xf32>
    %8 = vector.broadcast %7 : vector<1x128xf32> to vector<64x128xf32>
    %9 = arith.addf %6, %8 : vector<64x128xf32>
    %c0_7 = arith.constant 0 : index
    %c0_8 = arith.constant 0 : index
    %10 = vector.load %arg7[%c0_7, %c0_8] : memref<64x128xf32, #tpu.memory_space<vmem>>, vector<64x128xf32>
    tpu.vector_store %arg7[%c0_7, %c0_8], %9 {strides = array<i32>} : memref<64x128xf32, #tpu.memory_space<vmem>>, vector<64x128xf32>,
    %c0_9 = arith.constant 0 : index
    %c0_10 = arith.constant 0 : index
    %11 = vector.load %arg5[%c0_9, %c0_10] : memref<128x128xf32, #tpu.memory_space<vmem>>, vector<128x128xf32>
    %c0_11 = arith.constant 0 : index
    %c0_12 = arith.constant 0 : index
    %12 = vector.load %arg8[%c0_11, %c0_12] : memref<8x128xf32, #tpu.memory_space<vmem>>, vector<8x128xf32>
    %c0_i32_13 = arith.constant 0 : i32
    %c8_i32 = arith.constant 8 : i32
    %13 = arith.muli %c0_i32_13, %c8_i32 : i32
    %14 = tpu.assume_multiple %13, 8 : i32
    %15 = arith.index_cast %14 : i32 to index
    %c0_14 = arith.constant 0 : index
    %16 = vector.load %arg7[%15, %c0_14] : memref<64x128xf32, #tpu.memory_space<vmem>>, vector<8x128xf32>
    %cst_15 = arith.constant dense<0.000000e+00> : vector<8x128xf32>
    %17 = tpu.matmul %12, %11, %cst_15 {dimension_numbers = #tpu.dot_dimension_numbers<[1], [0], [0], [1], [0, 0, 1, 1], [], []>} : vector<8x128xf32>, vector<128x128xf32>, vector<8x128xf32> -> vector<8x128xf32>
    %18 = arith.addf %16, %17 : vector<8x128xf32>
    %19 = math.tanh %18 : vector<8x128xf32>
    %20 = arith.index_cast %c0_i32_13 : i32 to index
    %c0_16 = arith.constant 0 : index
    %c0_17 = arith.constant 0 : index
    %21 = vector.load %arg6[%20, %c0_16, %c0_17] : memref<8x8x128xf32, #tpu.memory_space<vmem>>, vector<1x8x128xf32>
    %22 = vector.shape_cast %21 : vector<1x8x128xf32> to vector<8x128xf32>
    %23 = vector.shape_cast %19 : vector<8x128xf32> to vector<1x8x128xf32>
    tpu.vector_store %arg6[%20, %c0_16, %c0_17], %23 {strides = array<i32>} : memref<8x8x128xf32, #tpu.memory_space<vmem>>, vector<1x8x128xf32>,
    %c1_i32 = arith.constant 1 : i32
    %c8_i32_18 = arith.constant 8 : i32
    %24 = arith.muli %c1_i32, %c8_i32_18 : i32
    %25 = tpu.assume_multiple %24, 8 : i32
    %26 = arith.index_cast %25 : i32 to index
    %c0_19 = arith.constant 0 : index
    %27 = vector.load %arg7[%26, %c0_19] : memref<64x128xf32, #tpu.memory_space<vmem>>, vector<8x128xf32>
    %cst_20 = arith.constant dense<0.000000e+00> : vector<8x128xf32>
    %28 = tpu.matmul %19, %11, %cst_20 {dimension_numbers = #tpu.dot_dimension_numbers<[1], [0], [0], [1], [0, 0, 1, 1], [], []>} : vector<8x128xf32>, vector<128x128xf32>, vector<8x128xf32> -> vector<8x128xf32>
    %29 = arith.addf %27, %28 : vector<8x128xf32>
    %30 = math.tanh %29 : vector<8x128xf32>
    %31 = arith.index_cast %c1_i32 : i32 to index
    %c0_21 = arith.constant 0 : index
    %c0_22 = arith.constant 0 : index
    %32 = vector.load %arg6[%31, %c0_21, %c0_22] : memref<8x8x128xf32, #tpu.memory_space<vmem>>, vector<1x8x128xf32>
    %33 = vector.shape_cast %32 : vector<1x8x128xf32> to vector<8x128xf32>
    %34 = vector.shape_cast %30 : vector<8x128xf32> to vector<1x8x128xf32>
    tpu.vector_store %arg6[%31, %c0_21, %c0_22], %34 {strides = array<i32>} : memref<8x8x128xf32, #tpu.memory_space<vmem>>, vector<1x8x128xf32>,
    %c2_i32 = arith.constant 2 : i32
    %c8_i32_23 = arith.constant 8 : i32
    %35 = arith.muli %c2_i32, %c8_i32_23 : i32
    %36 = tpu.assume_multiple %35, 8 : i32
    %37 = arith.index_cast %36 : i32 to index
    %c0_24 = arith.constant 0 : index
    %38 = vector.load %arg7[%37, %c0_24] : memref<64x128xf32, #tpu.memory_space<vmem>>, vector<8x128xf32>
    %cst_25 = arith.constant dense<0.000000e+00> : vector<8x128xf32>
    %39 = tpu.matmul %30, %11, %cst_25 {dimension_numbers = #tpu.dot_dimension_numbers<[1], [0], [0], [1], [0, 0, 1, 1], [], []>} : vector<8x128xf32>, vector<128x128xf32>, vector<8x128xf32> -> vector<8x128xf32>
    %40 = arith.addf %38, %39 : vector<8x128xf32>
    %41 = math.tanh %40 : vector<8x128xf32>
    %42 = arith.index_cast %c2_i32 : i32 to index
    %c0_26 = arith.constant 0 : index
    %c0_27 = arith.constant 0 : index
    %43 = vector.load %arg6[%42, %c0_26, %c0_27] : memref<8x8x128xf32, #tpu.memory_space<vmem>>, vector<1x8x128xf32>
    %44 = vector.shape_cast %43 : vector<1x8x128xf32> to vector<8x128xf32>
    %45 = vector.shape_cast %41 : vector<8x128xf32> to vector<1x8x128xf32>
    tpu.vector_store %arg6[%42, %c0_26, %c0_27], %45 {strides = array<i32>} : memref<8x8x128xf32, #tpu.memory_space<vmem>>, vector<1x8x128xf32>,
    %c3_i32 = arith.constant 3 : i32
    %c8_i32_28 = arith.constant 8 : i32
    %46 = arith.muli %c3_i32, %c8_i32_28 : i32
    %47 = tpu.assume_multiple %46, 8 : i32
    %48 = arith.index_cast %47 : i32 to index
    %c0_29 = arith.constant 0 : index
    %49 = vector.load %arg7[%48, %c0_29] : memref<64x128xf32, #tpu.memory_space<vmem>>, vector<8x128xf32>
    %cst_30 = arith.constant dense<0.000000e+00> : vector<8x128xf32>
    %50 = tpu.matmul %41, %11, %cst_30 {dimension_numbers = #tpu.dot_dimension_numbers<[1], [0], [0], [1], [0, 0, 1, 1], [], []>} : vector<8x128xf32>, vector<128x128xf32>, vector<8x128xf32> -> vector<8x128xf32>
    %51 = arith.addf %49, %50 : vector<8x128xf32>
    %52 = math.tanh %51 : vector<8x128xf32>
    %53 = arith.index_cast %c3_i32 : i32 to index
    %c0_31 = arith.constant 0 : index
    %c0_32 = arith.constant 0 : index
    %54 = vector.load %arg6[%53, %c0_31, %c0_32] : memref<8x8x128xf32, #tpu.memory_space<vmem>>, vector<1x8x128xf32>
    %55 = vector.shape_cast %54 : vector<1x8x128xf32> to vector<8x128xf32>
    %56 = vector.shape_cast %52 : vector<8x128xf32> to vector<1x8x128xf32>
    tpu.vector_store %arg6[%53, %c0_31, %c0_32], %56 {strides = array<i32>} : memref<8x8x128xf32, #tpu.memory_space<vmem>>, vector<1x8x128xf32>,
    %c4_i32 = arith.constant 4 : i32
    %c8_i32_33 = arith.constant 8 : i32
    %57 = arith.muli %c4_i32, %c8_i32_33 : i32
    %58 = tpu.assume_multiple %57, 8 : i32
    %59 = arith.index_cast %58 : i32 to index
    %c0_34 = arith.constant 0 : index
    %60 = vector.load %arg7[%59, %c0_34] : memref<64x128xf32, #tpu.memory_space<vmem>>, vector<8x128xf32>
    %cst_35 = arith.constant dense<0.000000e+00> : vector<8x128xf32>
    %61 = tpu.matmul %52, %11, %cst_35 {dimension_numbers = #tpu.dot_dimension_numbers<[1], [0], [0], [1], [0, 0, 1, 1], [], []>} : vector<8x128xf32>, vector<128x128xf32>, vector<8x128xf32> -> vector<8x128xf32>
    %62 = arith.addf %60, %61 : vector<8x128xf32>
    %63 = math.tanh %62 : vector<8x128xf32>
    %64 = arith.index_cast %c4_i32 : i32 to index
    %c0_36 = arith.constant 0 : index
    %c0_37 = arith.constant 0 : index
    %65 = vector.load %arg6[%64, %c0_36, %c0_37] : memref<8x8x128xf32, #tpu.memory_space<vmem>>, vector<1x8x128xf32>
    %66 = vector.shape_cast %65 : vector<1x8x128xf32> to vector<8x128xf32>
    %67 = vector.shape_cast %63 : vector<8x128xf32> to vector<1x8x128xf32>
    tpu.vector_store %arg6[%64, %c0_36, %c0_37], %67 {strides = array<i32>} : memref<8x8x128xf32, #tpu.memory_space<vmem>>, vector<1x8x128xf32>,
    %c5_i32 = arith.constant 5 : i32
    %c8_i32_38 = arith.constant 8 : i32
    %68 = arith.muli %c5_i32, %c8_i32_38 : i32
    %69 = tpu.assume_multiple %68, 8 : i32
    %70 = arith.index_cast %69 : i32 to index
    %c0_39 = arith.constant 0 : index
    %71 = vector.load %arg7[%70, %c0_39] : memref<64x128xf32, #tpu.memory_space<vmem>>, vector<8x128xf32>
    %cst_40 = arith.constant dense<0.000000e+00> : vector<8x128xf32>
    %72 = tpu.matmul %63, %11, %cst_40 {dimension_numbers = #tpu.dot_dimension_numbers<[1], [0], [0], [1], [0, 0, 1, 1], [], []>} : vector<8x128xf32>, vector<128x128xf32>, vector<8x128xf32> -> vector<8x128xf32>
    %73 = arith.addf %71, %72 : vector<8x128xf32>
    %74 = math.tanh %73 : vector<8x128xf32>
    %75 = arith.index_cast %c5_i32 : i32 to index
    %c0_41 = arith.constant 0 : index
    %c0_42 = arith.constant 0 : index
    %76 = vector.load %arg6[%75, %c0_41, %c0_42] : memref<8x8x128xf32, #tpu.memory_space<vmem>>, vector<1x8x128xf32>
    %77 = vector.shape_cast %76 : vector<1x8x128xf32> to vector<8x128xf32>
    %78 = vector.shape_cast %74 : vector<8x128xf32> to vector<1x8x128xf32>
    tpu.vector_store %arg6[%75, %c0_41, %c0_42], %78 {strides = array<i32>} : memref<8x8x128xf32, #tpu.memory_space<vmem>>, vector<1x8x128xf32>,
    %c6_i32 = arith.constant 6 : i32
    %c8_i32_43 = arith.constant 8 : i32
    %79 = arith.muli %c6_i32, %c8_i32_43 : i32
    %80 = tpu.assume_multiple %79, 8 : i32
    %81 = arith.index_cast %80 : i32 to index
    %c0_44 = arith.constant 0 : index
    %82 = vector.load %arg7[%81, %c0_44] : memref<64x128xf32, #tpu.memory_space<vmem>>, vector<8x128xf32>
    %cst_45 = arith.constant dense<0.000000e+00> : vector<8x128xf32>
    %83 = tpu.matmul %74, %11, %cst_45 {dimension_numbers = #tpu.dot_dimension_numbers<[1], [0], [0], [1], [0, 0, 1, 1], [], []>} : vector<8x128xf32>, vector<128x128xf32>, vector<8x128xf32> -> vector<8x128xf32>
    %84 = arith.addf %82, %83 : vector<8x128xf32>
    %85 = math.tanh %84 : vector<8x128xf32>
    %86 = arith.index_cast %c6_i32 : i32 to index
    %c0_46 = arith.constant 0 : index
    %c0_47 = arith.constant 0 : index
    %87 = vector.load %arg6[%86, %c0_46, %c0_47] : memref<8x8x128xf32, #tpu.memory_space<vmem>>, vector<1x8x128xf32>
    %88 = vector.shape_cast %87 : vector<1x8x128xf32> to vector<8x128xf32>
    %89 = vector.shape_cast %85 : vector<8x128xf32> to vector<1x8x128xf32>
    tpu.vector_store %arg6[%86, %c0_46, %c0_47], %89 {strides = array<i32>} : memref<8x8x128xf32, #tpu.memory_space<vmem>>, vector<1x8x128xf32>,
    %c7_i32 = arith.constant 7 : i32
    %c8_i32_48 = arith.constant 8 : i32
    %90 = arith.muli %c7_i32, %c8_i32_48 : i32
    %91 = tpu.assume_multiple %90, 8 : i32
    %92 = arith.index_cast %91 : i32 to index
    %c0_49 = arith.constant 0 : index
    %93 = vector.load %arg7[%92, %c0_49] : memref<64x128xf32, #tpu.memory_space<vmem>>, vector<8x128xf32>
    %cst_50 = arith.constant dense<0.000000e+00> : vector<8x128xf32>
    %94 = tpu.matmul %85, %11, %cst_50 {dimension_numbers = #tpu.dot_dimension_numbers<[1], [0], [0], [1], [0, 0, 1, 1], [], []>} : vector<8x128xf32>, vector<128x128xf32>, vector<8x128xf32> -> vector<8x128xf32>
    %95 = arith.addf %93, %94 : vector<8x128xf32>
    %96 = math.tanh %95 : vector<8x128xf32>
    %97 = arith.index_cast %c7_i32 : i32 to index
    %c0_51 = arith.constant 0 : index
    %c0_52 = arith.constant 0 : index
    %98 = vector.load %arg6[%97, %c0_51, %c0_52] : memref<8x8x128xf32, #tpu.memory_space<vmem>>, vector<1x8x128xf32>
    %99 = vector.shape_cast %98 : vector<1x8x128xf32> to vector<8x128xf32>
    %100 = vector.shape_cast %96 : vector<8x128xf32> to vector<1x8x128xf32>
    tpu.vector_store %arg6[%97, %c0_51, %c0_52], %100 {strides = array<i32>} : memref<8x8x128xf32, #tpu.memory_space<vmem>>, vector<1x8x128xf32>,
    %c8_i32_53 = arith.constant 8 : i32
    %c0_54 = arith.constant 0 : index
    %c0_55 = arith.constant 0 : index
    %101 = vector.load %arg8[%c0_54, %c0_55] : memref<8x128xf32, #tpu.memory_space<vmem>>, vector<8x128xf32>
    tpu.vector_store %arg8[%c0_54, %c0_55], %96 {strides = array<i32>} : memref<8x128xf32, #tpu.memory_space<vmem>>, vector<8x128xf32>,
    return
  }
  func.func @transform_0(%arg0: i32, %arg1: i32) -> (i32, i32, i32) {
    %c0_i32 = arith.constant 0 : i32
    %c0_i32_0 = arith.constant 0 : i32
    return %arg1, %arg0, %c0_i32 : i32, i32, i32
  }
  func.func @transform_1(%arg0: i32, %arg1: i32) -> (i32, i32) {
    %c0_i32 = arith.constant 0 : i32
    %c0_i32_0 = arith.constant 0 : i32
    %c0_i32_1 = arith.constant 0 : i32
    return %c0_i32, %c0_i32_0 : i32, i32
  }
  func.func @transform_2(%arg0: i32, %arg1: i32) -> (i32, i32) {
    %c0_i32 = arith.constant 0 : i32
    %c0_i32_0 = arith.constant 0 : i32
    %c0_i32_1 = arith.constant 0 : i32
    return %c0_i32, %c0_i32_0 : i32, i32
  }
  func.func @transform_3(%arg0: i32, %arg1: i32) -> (i32, i32) {
    %c0_i32 = arith.constant 0 : i32
    %c0_i32_0 = arith.constant 0 : i32
    %c0_i32_1 = arith.constant 0 : i32
    return %c0_i32, %c0_i32_0 : i32, i32
  }
  func.func @transform_4(%arg0: i32, %arg1: i32) -> (i32, i32, i32) {
    %c0_i32 = arith.constant 0 : i32
    %c0_i32_0 = arith.constant 0 : i32
    return %arg1, %arg0, %c0_i32 : i32, i32, i32
  }
}

</mosaic_0001>

<bundles_post_ra>
// kernel: mamba_forward.1
= control target key start
LH: loop header
LB: loop body
LE: loop exit
PB: predicated region body
PF: predicated region fallthrough
CT: control target
= control target key end

     0   :  { %vm38_vm0 = vcmask 261120   ;;  %v373_v21 = vmov 0.0   ;;  %s688_s3 = inlined_call_operand.vmem [shape: f32[128,128], index: 3, kind: input, shape index: {}]   ;;  %s689_s1 = inlined_call_operand.vmem [shape: f32[32,128], index: 1, kind: input, shape index: {}]   ;;  %s690_s0 = inlined_call_operand.vmem [shape: f32[8,8,32], index: 0, kind: input, shape index: {}]   ;;  %s691_s2 = inlined_call_operand.vmem [shape: f32[1,128], index: 2, kind: input, shape index: {}]   ;;  %s692_s4 = inlined_call_operand.vmem [shape: f32[8,8,128], index: 4, kind: output, shape index: {}]  }
   0x1   :  { %v402_v0 = vld [vmem:[%s688_s3 + $0x78] sm:$0xff]  ;;  %v407_v1 = vld [vmem:[%s688_s3 + $0x70] sm:$0xff]  ;;  %v414_v2 = vld [vmem:[%s688_s3 + $0x68] sm:$0xff] }
   0x2   :  { %130 = vmatpush.msra.mxu1 %v402_v0  ;;  %155 = vmatpush.msra.mxu2 %v402_v0  ;;  %v33_v3 = vld [vmem:[%s689_s1 + $0x18] sm:$0xff]  ;;  %v425_v4 = vld [vmem:[%s688_s3 + $0x60] sm:$0xff]  ;;  %v32_v5 = vld [vmem:[%s689_s1 + $0x10] sm:$0xff] }
   0x3   :  { %181 = vmatpush.msra.mxu3 %v402_v0  ;;  %75 = vmatpush.msra.mxu0 %v33_v3  ;;  %v31_v6 = vld [vmem:[%s689_s1 + $0x8] sm:$0xff]  ;;  %v439_v7 = vld [vmem:[%s688_s3 + $0x58] sm:$0xff]  ;;  %v30_v8 = vld [vmem:[%s689_s1] sm:$0xff] }
   0x4   :  { %131 = vmatpush.msra.mxu1 %v407_v1  ;;  %156 = vmatpush.msra.mxu2 %v407_v1  ;;  %v450_v9 = vld [vmem:[%s688_s3 + $0x50] sm:$0xff]  ;;  %v22_v10 = vld [vmem:[%s690_s0] sm:$0xff]  ;;  %v461_v11 = vld [vmem:[%s688_s3 + $0x48] sm:$0xff] }
   0x5   :  { %182 = vmatpush.msra.mxu3 %v407_v1  ;;  %76 = vmatpush.msra.mxu0 %v32_v5  ;;  %v469_v12 = vld [vmem:[%s688_s3 + $0x40] sm:$0xff]  ;;  %v478_v13 = vld [vmem:[%s688_s3 + $0x38] sm:$0xff]  ;;  %v487_v14 = vld [vmem:[%s688_s3 + $0x30] sm:$0xff] }
   0x6   :  { %132 = vmatpush.msra.mxu1 %v414_v2  ;;  %157 = vmatpush.msra.mxu2 %v414_v2  ;;  %v496_v15 = vld [vmem:[%s688_s3 + $0x28] sm:$0xff]  ;;  %v505_v16 = vld [vmem:[%s688_s3 + $0x20] sm:$0xff]  ;;  %v514_v17 = vld [vmem:[%s688_s3 + $0x18] sm:$0xff] }
   0x7   :  { %183 = vmatpush.msra.mxu3 %v414_v2  ;;  %77 = vmatpush.msra.mxu0 %v31_v6  ;;  %v523_v18 = vld [vmem:[%s688_s3 + $0x10] sm:$0xff]  ;;  %v532_v19 = vld [vmem:[%s688_s3 + $0x8] sm:$0xff]  ;;  %v541_v20 = vld [vmem:[%s688_s3] sm:$0xff] }
   0x8   :  { %133 = vmatpush.msra.mxu1 %v425_v4  ;;  %158 = vmatpush.msra.mxu2 %v425_v4  ;;  %v23_v22 = vld [vmem:[%s690_s0 + $0x8] sm:$0xff]  ;;  %v630_v23 = vld [vmem:[%s691_s2] ss:$0 sm:$0xff]  ;;  %v24_v29 = vld [vmem:[%s690_s0 + $0x10] sm:$0xff] }
   0x9   :  { %184 = vmatpush.msra.mxu3 %v425_v4  ;;  %78 = vmatpush.msra.mxu0 %v30_v8  ;;  %v25_v35 = vld [vmem:[%s690_s0 + $0x18] sm:$0xff]  ;;  %v26_v41 = vld [vmem:[%s690_s0 + $0x20] sm:$0xff]  ;;  %v27_v47 = vld [vmem:[%s690_s0 + $0x28] sm:$0xff] }
   0xa   :  { %134 = vmatpush.msra.mxu1 %v439_v7  ;;  %159 = vmatpush.msra.mxu2 %v439_v7  ;;  %v28_v48 = vld [vmem:[%s690_s0 + $0x30] sm:$0xff]  ;;  %v29_v54 = vld [vmem:[%s690_s0 + $0x38] sm:$0xff] }
   0xb   :  { %185 = vmatpush.msra.mxu3 %v439_v7  ;;  %340 = vmatmul.msk.f32.vlgmr.msra.gmra.mxu0 %vm38_vm0, %v22_v10 }
   0xc   :  { %135 = vmatpush.msra.mxu1 %v450_v9  ;;  %160 = vmatpush.msra.mxu2 %v450_v9 }
   0xd   :  { %186 = vmatpush.msra.mxu3 %v450_v9  ;;  %285 = vmatpush.msrb.mxu0 %v402_v0 }
   0xe   :  { %136 = vmatpush.msra.mxu1 %v461_v11  ;;  %161 = vmatpush.msra.mxu2 %v461_v11 }
   0xf   :  { %187 = vmatpush.msra.mxu3 %v461_v11  ;;  %286 = vmatpush.msrb.mxu0 %v407_v1 }
  0x10   :  { %137 = vmatpush.msra.mxu1 %v469_v12  ;;  %162 = vmatpush.msra.mxu2 %v469_v12 }
  0x11   :  { %188 = vmatpush.msra.mxu3 %v469_v12  ;;  %287 = vmatpush.msrb.mxu0 %v414_v2 }
  0x12   :  { %138 = vmatpush.msra.mxu1 %v478_v13  ;;  %163 = vmatpush.msra.mxu2 %v478_v13 }
  0x13   :  { %189 = vmatpush.msra.mxu3 %v478_v13  ;;  %288 = vmatpush.msrb.mxu0 %v425_v4 }
  0x14   :  { %139 = vmatpush.msra.mxu1 %v487_v14  ;;  %164 = vmatpush.msra.mxu2 %v487_v14 }
  0x15   :  { %190 = vmatpush.msra.mxu3 %v487_v14  ;;  %289 = vmatpush.msrb.mxu0 %v439_v7 }
  0x16   :  { %140 = vmatpush.msra.mxu1 %v496_v15  ;;  %165 = vmatpush.msra.mxu2 %v496_v15 }
  0x17   :  { %191 = vmatpush.msra.mxu3 %v496_v15  ;;  %290 = vmatpush.msrb.mxu0 %v450_v9 }
  0x18   :  { %141 = vmatpush.msra.mxu1 %v505_v16  ;;  %166 = vmatpush.msra.mxu2 %v505_v16 }
  0x19   :  { %192 = vmatpush.msra.mxu3 %v505_v16  ;;  %291 = vmatpush.msrb.mxu0 %v461_v11 }
  0x1a   :  { %142 = vmatpush.msra.mxu1 %v514_v17  ;;  %167 = vmatpush.msra.mxu2 %v514_v17 }
  0x1b   :  { %193 = vmatpush.msra.mxu3 %v514_v17  ;;  %292 = vmatpush.msrb.mxu0 %v469_v12 }
  0x1c   :  { %143 = vmatpush.msra.mxu1 %v523_v18  ;;  %168 = vmatpush.msra.mxu2 %v523_v18 }
  0x1d   :  { %194 = vmatpush.msra.mxu3 %v523_v18  ;;  %293 = vmatpush.msrb.mxu0 %v478_v13 }
  0x1e   :  { %144 = vmatpush.msra.mxu1 %v532_v19  ;;  %169 = vmatpush.msra.mxu2 %v532_v19 }
  0x1f   :  { %195 = vmatpush.msra.mxu3 %v532_v19  ;;  %294 = vmatpush.msrb.mxu0 %v487_v14 }
  0x20   :  { %145 = vmatpush.msra.mxu1 %v541_v20  ;;  %170 = vmatpush.msra.mxu2 %v541_v20 }
  0x21   :  { %146 = vmatmul.f32.vlgmr.msra.gmra.mxu1 %v373_v21  ;;  %196 = vmatpush.msra.mxu3 %v541_v20 }
  0x22   :  { %207 = vmatpush.msrb.mxu1 %v402_v0  ;;  %233 = vmatpush.msrb.mxu2 %v402_v0 }
  0x23   :  { %259 = vmatpush.msrb.mxu3 %v402_v0  ;;  %295 = vmatpush.msrb.mxu0 %v496_v15 }
  0x24   :  { %208 = vmatpush.msrb.mxu1 %v407_v1  ;;  %234 = vmatpush.msrb.mxu2 %v407_v1 }
  0x25   :  { %260 = vmatpush.msrb.mxu3 %v407_v1  ;;  %296 = vmatpush.msrb.mxu0 %v505_v16 }
  0x26   :  { %209 = vmatpush.msrb.mxu1 %v414_v2  ;;  %235 = vmatpush.msrb.mxu2 %v414_v2 }
  0x27   :  { %261 = vmatpush.msrb.mxu3 %v414_v2  ;;  %297 = vmatpush.msrb.mxu0 %v514_v17 }
  0x28   :  { %210 = vmatpush.msrb.mxu1 %v425_v4  ;;  %236 = vmatpush.msrb.mxu2 %v425_v4 }
  0x29   :  { %262 = vmatpush.msrb.mxu3 %v425_v4  ;;  %298 = vmatpush.msrb.mxu0 %v523_v18 }
  0x2a   :  { %211 = vmatpush.msrb.mxu1 %v439_v7  ;;  %237 = vmatpush.msrb.mxu2 %v439_v7 }
  0x2b   :  { %263 = vmatpush.msrb.mxu3 %v439_v7  ;;  %299 = vmatpush.msrb.mxu0 %v532_v19 }
  0x2c   :  { %212 = vmatpush.msrb.mxu1 %v450_v9  ;;  %238 = vmatpush.msrb.mxu2 %v450_v9 }
  0x2d   :  { %264 = vmatpush.msrb.mxu3 %v450_v9  ;;  %300 = vmatpush.msrb.mxu0 %v541_v20 }
  0x2e   :  { %213 = vmatpush.msrb.mxu1 %v461_v11  ;;  %239 = vmatpush.msrb.mxu2 %v461_v11 }
  0x2f   :  { %265 = vmatpush.msrb.mxu3 %v461_v11  ;;  %341 = vmatmul.msk.f32.gmra.mxu0 %vm38_vm0, %v23_v22 }
  0x30   :  { %214 = vmatpush.msrb.mxu1 %v469_v12  ;;  %240 = vmatpush.msrb.mxu2 %v469_v12 }
  0x31   :  { %266 = vmatpush.msrb.mxu3 %v469_v12 }
  0x32   :  { %215 = vmatpush.msrb.mxu1 %v478_v13  ;;  %241 = vmatpush.msrb.mxu2 %v478_v13 }
  0x33   :  { %267 = vmatpush.msrb.mxu3 %v478_v13 }
  0x34   :  { %216 = vmatpush.msrb.mxu1 %v487_v14  ;;  %242 = vmatpush.msrb.mxu2 %v487_v14 }
  0x35   :  { %268 = vmatpush.msrb.mxu3 %v487_v14 }
  0x36   :  { %217 = vmatpush.msrb.mxu1 %v496_v15  ;;  %243 = vmatpush.msrb.mxu2 %v496_v15 }
  0x37   :  { %269 = vmatpush.msrb.mxu3 %v496_v15  ;;  %342 = vmatmul.msk.f32.gmra.mxu0 %vm38_vm0, %v24_v29 }
  0x38   :  { %218 = vmatpush.msrb.mxu1 %v505_v16  ;;  %244 = vmatpush.msrb.mxu2 %v505_v16 }
  0x39   :  { %270 = vmatpush.msrb.mxu3 %v505_v16 }
  0x3a   :  { %219 = vmatpush.msrb.mxu1 %v514_v17  ;;  %245 = vmatpush.msrb.mxu2 %v514_v17 }
  0x3b   :  { %271 = vmatpush.msrb.mxu3 %v514_v17 }
  0x3c   :  { %220 = vmatpush.msrb.mxu1 %v523_v18  ;;  %246 = vmatpush.msrb.mxu2 %v523_v18 }
  0x3d   :  { %272 = vmatpush.msrb.mxu3 %v523_v18 }
  0x3e   :  { %221 = vmatpush.msrb.mxu1 %v532_v19  ;;  %247 = vmatpush.msrb.mxu2 %v532_v19 }
  0x3f   :  { %273 = vmatpush.msrb.mxu3 %v532_v19  ;;  %343 = vmatmul.msk.f32.gmra.mxu0 %vm38_vm0, %v25_v35 }
  0x40   :  { %222 = vmatpush.msrb.mxu1 %v541_v20  ;;  %248 = vmatpush.msrb.mxu2 %v541_v20 }
  0x41   :  { %274 = vmatpush.msrb.mxu3 %v541_v20 }
  0x42   :  { %311 = vmatpush.msra.mxu1 %v402_v0 }
  0x44   :  { %312 = vmatpush.msra.mxu1 %v407_v1 }
  0x46   :  { %313 = vmatpush.msra.mxu1 %v414_v2 }
  0x47   :  { %344 = vmatmul.msk.f32.gmra.mxu0 %vm38_vm0, %v26_v41 }
  0x48   :  { %314 = vmatpush.msra.mxu1 %v425_v4 }
  0x4a   :  { %315 = vmatpush.msra.mxu1 %v439_v7 }
  0x4c   :  { %316 = vmatpush.msra.mxu1 %v450_v9 }
  0x4e   :  { %317 = vmatpush.msra.mxu1 %v461_v11 }
  0x4f   :  { %345 = vmatmul.msk.f32.gmra.mxu0 %vm38_vm0, %v27_v47 }
  0x50   :  { %318 = vmatpush.msra.mxu1 %v469_v12 }
  0x52   :  { %319 = vmatpush.msra.mxu1 %v478_v13 }
  0x54   :  { %320 = vmatpush.msra.mxu1 %v487_v14 }
  0x56   :  { %321 = vmatpush.msra.mxu1 %v496_v15 }
  0x57   :  { %346 = vmatmul.msk.f32.gmra.mxu0 %vm38_vm0, %v28_v48 }
  0x58   :  { %322 = vmatpush.msra.mxu1 %v505_v16 }
  0x5a   :  { %323 = vmatpush.msra.mxu1 %v514_v17 }
  0x5c   :  { %324 = vmatpush.msra.mxu1 %v523_v18 }
  0x5e   :  { %325 = vmatpush.msra.mxu1 %v532_v19 }
  0x5f   :  { %347 = vmatmul.msk.f32.gmra.mxu0 %vm38_vm0, %v29_v54 }
  0x60   :  { %326 = vmatpush.msra.mxu1 %v541_v20 }
  0x88   :  { %v80_v24 = vpop.f32.mrf.mxu0 }
  0x89   :  { %v81_v25 = vadd.f32 %v630_v23, %v80_v24 }
  0x9e   :  { %v147_v26 = vpop.f32.mrf.mxu1 }
  0x9f   :  { %v150_v27 = vadd.f32 %v147_v26, %v81_v25 }
  0xa1   :  { %357 = vtanh.f32 %v150_v27 }
  0xa7   :  { %v358_v28 = vpop.eup %357 }
  0xa8   :  { %152 = vst [vmem:[%s692_s4] sm:$0xff] %v358_v28  ;;  %171 = vmatmul.f32.vlgmr.msra.gmra.mxu2 %v358_v28 }
  0xac   :  { %v83_v30 = vpop.f32.mrf.mxu0 }
  0xad   :  { %v84_v31 = vadd.f32 %v630_v23, %v83_v30 }
  0xb4   :  { %v86_v36 = vpop.f32.mrf.mxu0 }
  0xb5   :  { %v87_v37 = vadd.f32 %v630_v23, %v86_v36 }
  0xbc   :  { %v89_v42 = vpop.f32.mrf.mxu0 }
  0xbd   :  { %v90_v43 = vadd.f32 %v630_v23, %v89_v42 }
  0xc4   :  { %v92_v49 = vpop.f32.mrf.mxu0 }
  0xc5   :  { %v93_v50 = vadd.f32 %v630_v23, %v92_v49 }
  0xcc   :  { %v95_v55 = vpop.f32.mrf.mxu0 }
  0xcd   :  { %v96_v56 = vadd.f32 %v630_v23, %v95_v55 }
  0xd4   :  { %v98_v60 = vpop.f32.mrf.mxu0 }
  0xd5   :  { %v99_v62 = vadd.f32 %v630_v23, %v98_v60 }
  0xdc   :  { %v101_v61 = vpop.f32.mrf.mxu0 }
  0xdd   :  { %v102_v2 = vadd.f32 %v630_v23, %v101_v61 }
 0x12b   :  { %v172_v32 = vpop.f32.mrf.mxu2 }
 0x12c   :  { %v175_v33 = vadd.f32 %v172_v32, %v84_v31 }
 0x12e   :  { %359 = vtanh.f32 %v175_v33 }
 0x134   :  { %v360_v34 = vpop.eup %359 }
 0x135   :  { %348 = vst [vmem:[%s692_s4 + $0x8] sm:$0xff] %v360_v34  ;;  %197 = vmatmul.f32.vlgmr.msra.gmra.mxu3 %v360_v34 }
 0x1b8   :  { %v198_v38 = vpop.f32.mrf.mxu3 }
 0x1b9   :  { %v201_v39 = vadd.f32 %v198_v38, %v87_v37 }
 0x1bb   :  { %361 = vtanh.f32 %v201_v39 }
 0x1c1   :  { %v362_v40 = vpop.eup %361 }
 0x1c2   :  { %349 = vst [vmem:[%s692_s4 + $0x10] sm:$0xff] %v362_v40  ;;  %223 = vmatmul.f32.vlgmr.msrb.gmra.mxu1 %v362_v40 }
 0x23f   :  { %v224_v44 = vpop.f32.mrf.mxu1 }
 0x240   :  { %v227_v45 = vadd.f32 %v224_v44, %v90_v43 }
 0x242   :  { %363 = vtanh.f32 %v227_v45 }
 0x248   :  { %v364_v46 = vpop.eup %363 }
 0x249   :  { %350 = vst [vmem:[%s692_s4 + $0x18] sm:$0xff] %v364_v46  ;;  %249 = vmatmul.f32.vlgmr.msrb.gmra.mxu2 %v364_v46 }
 0x2cc   :  { %v250_v51 = vpop.f32.mrf.mxu2 }
 0x2cd   :  { %v253_v52 = vadd.f32 %v250_v51, %v93_v50 }
 0x2cf   :  { %365 = vtanh.f32 %v253_v52 }
 0x2d5   :  { %v366_v53 = vpop.eup %365 }
 0x2d6   :  { %351 = vst [vmem:[%s692_s4 + $0x20] sm:$0xff] %v366_v53  ;;  %275 = vmatmul.f32.vlgmr.msrb.gmra.mxu3 %v366_v53 }
 0x359   :  { %v276_v57 = vpop.f32.mrf.mxu3 }
 0x35a   :  { %v279_v58 = vadd.f32 %v276_v57, %v96_v56 }
 0x35c   :  { %367 = vtanh.f32 %v279_v58 }
 0x362   :  { %v368_v59 = vpop.eup %367 }
 0x363   :  { %352 = vst [vmem:[%s692_s4 + $0x28] sm:$0xff] %v368_v59  ;;  %301 = vmatmul.f32.vlgmr.msrb.gmra.mxu0 %v368_v59 }
 0x3e0   :  { %v302_v63 = vpop.f32.mrf.mxu0 }
 0x3e1   :  { %v305_v0 = vadd.f32 %v302_v63, %v99_v62 }
 0x3e3   :  { %369 = vtanh.f32 %v305_v0 }
 0x3e9   :  { %v370_v1 = vpop.eup %369 }
 0x3ea   :  { %353 = vst [vmem:[%s692_s4 + $0x30] sm:$0xff] %v370_v1  ;;  %327 = vmatmul.f32.vlgmr.msra.gmra.mxu1 %v370_v1 }
 0x467   :  { %v328_v3 = vpop.f32.mrf.mxu1 }
 0x468   :  { %v331_v4 = vadd.f32 %v328_v3, %v102_v2 }
 0x46a   :  { %371 = vtanh.f32 %v331_v4 }
 0x470   :  { %v372_v5 = vpop.eup %371 }
 0x471   :  { %354 = vst [vmem:[%s692_s4 + $0x38] sm:$0xff] %v372_v5 }

</bundles_post_ra>
